<compile_context>
chip_gen: v7x
topology: tpu7x:2x2x1
jax: 0.10.0
libtpu: 0.0.40
codegen_flags: <defaults>
</compile_context>

<pallas_src>
import functools

import jax
import jax.numpy as jnp
from jax.experimental import pallas as pl
from jax.experimental.pallas import tpu as pltpu

OUT_PAD = 128          # lane-dense output width; q1 -> lane 0, q2 -> lane 1
_TINY_BATCH = 512      # below this, keep a single grid step (splitting sub-us work is overhead)


def _round_up(n, m):
    return ((n + m - 1) // m) * m


def qnetwork_fused_kernel(x_ref, w_in_ref, w_mid_ref, w_out_ref, b_ref, out_ref):
    """Twin-Q forward: fused layer-1 matmul, per-branch mid matmuls, lane-packed output."""
    hp = w_mid_ref.shape[1]                        # padded hidden (multiple of 128)

    x = x_ref[...].astype(jnp.bfloat16)

    # Layer 1 (both branches share x): (tb, d_in) @ (d_in, 2*Hp).
    h = jnp.dot(x, w_in_ref[...], preferred_element_type=jnp.float32)
    h = jnp.maximum(h + b_ref[0:1, :], 0.0).astype(jnp.bfloat16)
    h1 = h[:, :hp]                                 # branch 1 (lane-aligned slice)
    h2 = h[:, hp:]                                 # branch 2

    # Layer 2: one (Hp, Hp) matmul per branch (no block-diag structural zeros).
    g1 = jnp.dot(h1, w_mid_ref[0], preferred_element_type=jnp.float32)
    g1 = jnp.maximum(g1 + b_ref[1:2, :hp], 0.0).astype(jnp.bfloat16)
    g2 = jnp.dot(h2, w_mid_ref[1], preferred_element_type=jnp.float32)
    g2 = jnp.maximum(g2 + b_ref[2:3, :hp], 0.0).astype(jnp.bfloat16)

    # Layer 3: q1 lands in lane 0 (from w_out[0]), q2 in lane 1 (from w_out[1]).
    q = jnp.dot(g1, w_out_ref[0], preferred_element_type=jnp.float32)
    q = q + jnp.dot(g2, w_out_ref[1], preferred_element_type=jnp.float32)
    out_ref[...] = (q + b_ref[3:4, :OUT_PAD]).astype(out_ref.dtype)


def _choose_batch_tile(batch, batch_tile):
    tb_single = _round_up(batch, 8)
    if tb_single <= _TINY_BATCH:
        return tb_single                           # one step: don't split tiny work
    # >= 2 grid steps so the "parallel" axis can shard across v7x's two TensorCores.
    half = _round_up((batch + 1) // 2, 8)
    return min(batch_tile, half)


@functools.partial(jax.jit, static_argnames=("batch_tile",))
def qnetwork_forward(x, packed, batch_tile=1024):
    """Returns (q1, q2), each (B, 1) float32 — same semantics as QNetwork.forward."""
    w_in, w_mid, w_out, b = packed
    B, d_in = x.shape
    hp = w_mid.shape[1]

    tb = _choose_batch_tile(B, batch_tile)
    b_pad = _round_up(B, tb)
    if b_pad != B:
        x = jnp.pad(x, ((0, b_pad - B), (0, 0)))

    # Scoped-VMEM budget: double-buffered weight slabs + x/out tiles + activation
    # intermediates, clamped to [32 MiB, 64 MiB] (v5e default limit is only 16 MiB;
    # v7x physical VMEM is 64 MiB).
    weight_bytes = (w_in.size + w_mid.size + w_out.size) * 2 + b.size * 4
    io_bytes = tb * d_in * 4 + tb * OUT_PAD * 2
    act_bytes = 3 * tb * 2 * hp * 4
    vmem_limit = int(min(max(2 * (weight_bytes + io_bytes) + act_bytes,
                             32 * 1024 * 1024), 64 * 1024 * 1024))

    out = pl.pallas_call(
        qnetwork_fused_kernel,
        out_shape=jax.ShapeDtypeStruct((b_pad, OUT_PAD), jnp.bfloat16),
        grid_spec=pltpu.PrefetchScalarGridSpec(
            num_scalar_prefetch=0,
            grid=(b_pad // tb,),
            in_specs=[
                pl.BlockSpec((tb, d_in), lambda i: (i, 0)),            # x, tiled over batch
                pl.BlockSpec((d_in, 2 * hp), lambda i: (0, 0)),        # W_in  (resident)
                pl.BlockSpec((2, hp, hp), lambda i: (0, 0, 0)),        # W2/W5 (resident)
                pl.BlockSpec((2, hp, OUT_PAD), lambda i: (0, 0, 0)),   # W3/W6 (resident)
                pl.BlockSpec((4, 2 * hp), lambda i: (0, 0)),           # packed biases
            ],
            out_specs=pl.BlockSpec((tb, OUT_PAD), lambda i: (i, 0)),
        ),
        compiler_params=pltpu.CompilerParams(
            dimension_semantics=("parallel",),
            vmem_limit_bytes=vmem_limit,
        ),
    )(x, w_in, w_mid, w_out, b)

    q1 = out[:B, 0:1].astype(jnp.float32)
    q2 = out[:B, 1:2].astype(jnp.float32)
    return q1, q2


# ---------------------------------------------------------------------------
# Parameter init (mirrors torch xavier_uniform_ + zero bias) and packing.
# ---------------------------------------------------------------------------
def xavier_uniform(key, in_dim, out_dim):
    limit = jnp.sqrt(6.0 / (in_dim + out_dim))
    return jax.random.uniform(key, (in_dim, out_dim), jnp.float32, -limit, limit)


def init_qnetwork_params(key, num_inputs, num_actions, hidden_dim):
    d_in = num_inputs + num_actions
    keys = jax.random.split(key, 6)
    w1 = xavier_uniform(keys[0], d_in, hidden_dim);       b1 = jnp.zeros((1, hidden_dim), jnp.float32)
    w2 = xavier_uniform(keys[1], hidden_dim, hidden_dim); b2 = jnp.zeros((1, hidden_dim), jnp.float32)
    w3 = xavier_uniform(keys[2], hidden_dim, 1);          b3 = jnp.zeros((1, 1), jnp.float32)
    w4 = xavier_uniform(keys[3], d_in, hidden_dim);       b4 = jnp.zeros((1, hidden_dim), jnp.float32)
    w5 = xavier_uniform(keys[4], hidden_dim, hidden_dim); b5 = jnp.zeros((1, hidden_dim), jnp.float32)
    w6 = xavier_uniform(keys[5], hidden_dim, 1);          b6 = jnp.zeros((1, 1), jnp.float32)
    return (w1, b1, w2, b2, w3, b3, w4, b4, w5, b5, w6, b6)


def pack_qnetwork_params(params):
    """Pack the twin-branch weights into 3 bf16 slabs + one f32 bias array.

    hidden is zero-padded to Hp = round_up(hidden, 128) so all lane splits in the
    kernel are tile-aligned.  Padded rows/cols are zero, so they do not change results.
    """
    w1, b1, w2, b2, w3, b3, w4, b4, w5, b5, w6, b6 = params
    d_in, hidden = w1.shape
    hp = _round_up(hidden, 128)

    w_in = jnp.zeros((d_in, 2 * hp), jnp.float32)
    w_in = w_in.at[:, :hidden].set(w1).at[:, hp:hp + hidden].set(w4)
    w_in = w_in.astype(jnp.bfloat16)                               # (d_in, 2*Hp)

    w_mid = jnp.zeros((2, hp, hp), jnp.float32)
    w_mid = w_mid.at[0, :hidden, :hidden].set(w2).at[1, :hidden, :hidden].set(w5)
    w_mid = w_mid.astype(jnp.bfloat16)                             # (2, Hp, Hp)

    w_out = jnp.zeros((2, hp, OUT_PAD), jnp.float32)
    w_out = w_out.at[0, :hidden, 0].set(w3[:, 0]).at[1, :hidden, 1].set(w6[:, 0])
    w_out = w_out.astype(jnp.bfloat16)                             # (2, Hp, 128)

    b = jnp.zeros((4, 2 * hp), jnp.float32)
    b = b.at[0, :hidden].set(b1[0]).at[0, hp:hp + hidden].set(b4[0])
    b = b.at[1, :hidden].set(b2[0])
    b = b.at[2, :hidden].set(b5[0])
    b = b.at[3, 0].set(b3[0, 0]).at[3, 1].set(b6[0, 0])
    return (w_in, w_mid, w_out, b)


def qnetwork_reference(x, params):
    """Pure-JAX reference mirroring the kernel's bf16-weight / f32-accumulate numerics."""
    w1, b1, w2, b2, w3, b3, w4, b4, w5, b5, w6, b6 = params

    def lin(a, w, bias):
        return jnp.dot(a.astype(jnp.bfloat16), w.astype(jnp.bfloat16),
                       preferred_element_type=jnp.float32) + bias

    h1 = jax.nn.relu(lin(x, w1, b1))
    h1 = jax.nn.relu(lin(h1, w2, b2))
    q1 = lin(h1, w3, b3)
    h2 = jax.nn.relu(lin(x, w4, b4))
    h2 = jax.nn.relu(lin(h2, w5, b5))
    q2 = lin(h2, w6, b6)
    return q1, q2


if __name__ == "__main__":
    num_inputs, num_actions, hidden_dim = 8, 4, 32
    d_in = num_inputs + num_actions

    key = jax.random.PRNGKey(0)
    k_params, k_x1, k_x2 = jax.random.split(key, 3)
    params = init_qnetwork_params(k_params, num_inputs, num_actions, hidden_dim)
    packed = pack_qnetwork_params(params)

    # Small batch (single-tile / single grid-step path).
    x_small = jax.random.normal(k_x1, (2, d_in), jnp.float32)
    q1, q2 = qnetwork_forward(x_small, packed)
    jax.block_until_ready((q1, q2))
    q1_ref, q2_ref = qnetwork_reference(x_small, params)
    assert q1.shape == (2, 1) and q2.shape == (2, 1)
    # bf16 weights + bf16 output store => bf16-level tolerance (intentional numerics change).
    assert jnp.allclose(q1, q1_ref, atol=1e-2, rtol=1e-2)
    assert jnp.allclose(q2, q2_ref, atol=1e-2, rtol=1e-2)

    # Larger batch exercising the multi-step "parallel" grid + batch-padding path.
    x_big = jax.random.normal(k_x2, (600, d_in), jnp.float32)
    q1b, q2b = qnetwork_forward(x_big, packed)
    jax.block_until_ready((q1b, q2b))
    q1b_ref, q2b_ref = qnetwork_reference(x_big, params)
    assert q1b.shape == (600, 1) and q2b.shape == (600, 1)
    assert jnp.allclose(q1b, q1b_ref, atol=1e-2, rtol=1e-2)
    assert jnp.allclose(q2b, q2b_ref, atol=1e-2, rtol=1e-2)

    print("KERNEL_OK")
</pallas_src>

<mosaic_0001>
module attributes {stable_mosaic.version = 11 : i64} {
  func.func @qnetwork_fused_kernel(%arg0: i32, %arg1: memref<8x12xf32, #tpu.memory_space<vmem>>, %arg2: memref<12x256xbf16, #tpu.memory_space<vmem>>, %arg3: memref<2x128x128xbf16, #tpu.memory_space<vmem>>, %arg4: memref<2x128x128xbf16, #tpu.memory_space<vmem>>, %arg5: memref<4x256xf32, #tpu.memory_space<vmem>>, %arg6: memref<8x128xbf16, #tpu.memory_space<vmem>>) attributes {dimension_semantics = [#tpu.dimension_semantics<parallel>], iteration_bounds = array<i64: 1>, scalar_prefetch = 0 : i64, scratch_operands = 0 : i64, tpu.core_type = #tpu.core_type<tc>, window_params = [{transform_indices = @transform_0, window_bounds = array<i64: 8, 12>}, {pipeline_mode = #tpu.pipeline_mode<synchronous>, transform_indices = @transform_1, window_bounds = array<i64: 12, 256>}, {pipeline_mode = #tpu.pipeline_mode<synchronous>, transform_indices = @transform_2, window_bounds = array<i64: 2, 128, 128>}, {pipeline_mode = #tpu.pipeline_mode<synchronous>, transform_indices = @transform_3, window_bounds = array<i64: 2, 128, 128>}, {pipeline_mode = #tpu.pipeline_mode<synchronous>, transform_indices = @transform_4, window_bounds = array<i64: 4, 256>}, {transform_indices = @transform_5, window_bounds = array<i64: 8, 128>}]} {
    %c0 = arith.constant 0 : index
    %c0_0 = arith.constant 0 : index
    %0 = vector.load %arg1[%c0, %c0_0] : memref<8x12xf32, #tpu.memory_space<vmem>>, vector<8x12xf32>
    %1 = arith.truncf %0 : vector<8x12xf32> to vector<8x12xbf16>
    %c0_1 = arith.constant 0 : index
    %c0_2 = arith.constant 0 : index
    %2 = vector.load %arg2[%c0_1, %c0_2] : memref<12x256xbf16, #tpu.memory_space<vmem>>, vector<12x256xbf16>
    %cst = arith.constant dense<0.000000e+00> : vector<8x256xf32>
    %3 = tpu.matmul %1, %2, %cst {dimension_numbers = #tpu.dot_dimension_numbers<[1], [0], [0], [1], [0, 0, 1, 1], [], []>} : vector<8x12xbf16>, vector<12x256xbf16>, vector<8x256xf32> -> vector<8x256xf32>
    %c0_3 = arith.constant 0 : index
    %c0_4 = arith.constant 0 : index
    %4 = vector.load %arg5[%c0_3, %c0_4] : memref<4x256xf32, #tpu.memory_space<vmem>>, vector<1x256xf32>
    %5 = vector.broadcast %4 : vector<1x256xf32> to vector<8x256xf32>
    %6 = arith.addf %3, %5 : vector<8x256xf32>
    %cst_5 = arith.constant 0.000000e+00 : f32
    %7 = vector.broadcast %cst_5 : f32 to vector<8x256xf32>
    %8 = arith.maximumf %6, %7 : vector<8x256xf32>
    %9 = arith.truncf %8 : vector<8x256xf32> to vector<8x256xbf16>
    %10 = vector.extract_strided_slice %9 {offsets = [0, 0], sizes = [8, 128], strides = [1, 1]} : vector<8x256xbf16> to vector<8x128xbf16>
    %11 = vector.extract_strided_slice %9 {offsets = [0, 128], sizes = [8, 128], strides = [1, 1]} : vector<8x256xbf16> to vector<8x128xbf16>
    %c0_6 = arith.constant 0 : index
    %c0_7 = arith.constant 0 : index
    %c0_8 = arith.constant 0 : index
    %12 = vector.load %arg3[%c0_6, %c0_7, %c0_8] : memref<2x128x128xbf16, #tpu.memory_space<vmem>>, vector<1x128x128xbf16>
    %13 = vector.shape_cast %12 : vector<1x128x128xbf16> to vector<128x128xbf16>
    %cst_9 = arith.constant dense<0.000000e+00> : vector<8x128xf32>
    %14 = tpu.matmul %10, %13, %cst_9 {dimension_numbers = #tpu.dot_dimension_numbers<[1], [0], [0], [1], [0, 0, 1, 1], [], []>} : vector<8x128xbf16>, vector<128x128xbf16>, vector<8x128xf32> -> vector<8x128xf32>
    %c1 = arith.constant 1 : index
    %c0_10 = arith.constant 0 : index
    %15 = vector.load %arg5[%c1, %c0_10] : memref<4x256xf32, #tpu.memory_space<vmem>>, vector<1x128xf32>
    %16 = vector.broadcast %15 : vector<1x128xf32> to vector<8x128xf32>
    %17 = arith.addf %14, %16 : vector<8x128xf32>
    %cst_11 = arith.constant 0.000000e+00 : f32
    %18 = vector.broadcast %cst_11 : f32 to vector<8x128xf32>
    %19 = arith.maximumf %17, %18 : vector<8x128xf32>
    %20 = arith.truncf %19 : vector<8x128xf32> to vector<8x128xbf16>
    %c1_12 = arith.constant 1 : index
    %c0_13 = arith.constant 0 : index
    %c0_14 = arith.constant 0 : index
    %21 = vector.load %arg3[%c1_12, %c0_13, %c0_14] : memref<2x128x128xbf16, #tpu.memory_space<vmem>>, vector<1x128x128xbf16>
    %22 = vector.shape_cast %21 : vector<1x128x128xbf16> to vector<128x128xbf16>
    %cst_15 = arith.constant dense<0.000000e+00> : vector<8x128xf32>
    %23 = tpu.matmul %11, %22, %cst_15 {dimension_numbers = #tpu.dot_dimension_numbers<[1], [0], [0], [1], [0, 0, 1, 1], [], []>} : vector<8x128xbf16>, vector<128x128xbf16>, vector<8x128xf32> -> vector<8x128xf32>
    %c2 = arith.constant 2 : index
    %c0_16 = arith.constant 0 : index
    %24 = vector.load %arg5[%c2, %c0_16] : memref<4x256xf32, #tpu.memory_space<vmem>>, vector<1x128xf32>
    %25 = vector.broadcast %24 : vector<1x128xf32> to vector<8x128xf32>
    %26 = arith.addf %23, %25 : vector<8x128xf32>
    %cst_17 = arith.constant 0.000000e+00 : f32
    %27 = vector.broadcast %cst_17 : f32 to vector<8x128xf32>
    %28 = arith.maximumf %26, %27 : vector<8x128xf32>
    %29 = arith.truncf %28 : vector<8x128xf32> to vector<8x128xbf16>
    %c0_18 = arith.constant 0 : index
    %c0_19 = arith.constant 0 : index
    %c0_20 = arith.constant 0 : index
    %30 = vector.load %arg4[%c0_18, %c0_19, %c0_20] : memref<2x128x128xbf16, #tpu.memory_space<vmem>>, vector<1x128x128xbf16>
    %31 = vector.shape_cast %30 : vector<1x128x128xbf16> to vector<128x128xbf16>
    %cst_21 = arith.constant dense<0.000000e+00> : vector<8x128xf32>
    %32 = tpu.matmul %20, %31, %cst_21 {dimension_numbers = #tpu.dot_dimension_numbers<[1], [0], [0], [1], [0, 0, 1, 1], [], []>} : vector<8x128xbf16>, vector<128x128xbf16>, vector<8x128xf32> -> vector<8x128xf32>
    %c1_22 = arith.constant 1 : index
    %c0_23 = arith.constant 0 : index
    %c0_24 = arith.constant 0 : index
    %33 = vector.load %arg4[%c1_22, %c0_23, %c0_24] : memref<2x128x128xbf16, #tpu.memory_space<vmem>>, vector<1x128x128xbf16>
    %34 = vector.shape_cast %33 : vector<1x128x128xbf16> to vector<128x128xbf16>
    %cst_25 = arith.constant dense<0.000000e+00> : vector<8x128xf32>
    %35 = tpu.matmul %29, %34, %cst_25 {dimension_numbers = #tpu.dot_dimension_numbers<[1], [0], [0], [1], [0, 0, 1, 1], [], []>} : vector<8x128xbf16>, vector<128x128xbf16>, vector<8x128xf32> -> vector<8x128xf32>
    %36 = arith.addf %32, %35 : vector<8x128xf32>
    %c3 = arith.constant 3 : index
    %c0_26 = arith.constant 0 : index
    %37 = vector.load %arg5[%c3, %c0_26] : memref<4x256xf32, #tpu.memory_space<vmem>>, vector<1x128xf32>
    %38 = vector.broadcast %37 : vector<1x128xf32> to vector<8x128xf32>
    %39 = arith.addf %36, %38 : vector<8x128xf32>
    %40 = arith.truncf %39 : vector<8x128xf32> to vector<8x128xbf16>
    %c0_27 = arith.constant 0 : index
    %c0_28 = arith.constant 0 : index
    %41 = vector.load %arg6[%c0_27, %c0_28] : memref<8x128xbf16, #tpu.memory_space<vmem>>, vector<8x128xbf16>
    tpu.vector_store %arg6[%c0_27, %c0_28], %40 {strides = array<i32>} : memref<8x128xbf16, #tpu.memory_space<vmem>>, vector<8x128xbf16>,
    return
  }
  func.func @transform_0(%arg0: i32) -> (i32, i32) {
    %c0_i32 = arith.constant 0 : i32
    %c0_i32_0 = arith.constant 0 : i32
    return %arg0, %c0_i32 : i32, i32
  }
  func.func @transform_1(%arg0: i32) -> (i32, i32) {
    %c0_i32 = arith.constant 0 : i32
    %c0_i32_0 = arith.constant 0 : i32
    %c0_i32_1 = arith.constant 0 : i32
    return %c0_i32, %c0_i32_0 : i32, i32
  }
  func.func @transform_2(%arg0: i32) -> (i32, i32, i32) {
    %c0_i32 = arith.constant 0 : i32
    %c0_i32_0 = arith.constant 0 : i32
    %c0_i32_1 = arith.constant 0 : i32
    %c0_i32_2 = arith.constant 0 : i32
    return %c0_i32, %c0_i32_0, %c0_i32_1 : i32, i32, i32
  }
  func.func @transform_3(%arg0: i32) -> (i32, i32, i32) {
    %c0_i32 = arith.constant 0 : i32
    %c0_i32_0 = arith.constant 0 : i32
    %c0_i32_1 = arith.constant 0 : i32
    %c0_i32_2 = arith.constant 0 : i32
    return %c0_i32, %c0_i32_0, %c0_i32_1 : i32, i32, i32
  }
  func.func @transform_4(%arg0: i32) -> (i32, i32) {
    %c0_i32 = arith.constant 0 : i32
    %c0_i32_0 = arith.constant 0 : i32
    %c0_i32_1 = arith.constant 0 : i32
    return %c0_i32, %c0_i32_0 : i32, i32
  }
  func.func @transform_5(%arg0: i32) -> (i32, i32) {
    %c0_i32 = arith.constant 0 : i32
    %c0_i32_0 = arith.constant 0 : i32
    return %arg0, %c0_i32 : i32, i32
  }
}

</mosaic_0001>

<bundles_post_ra>
// kernel: qnetwork_forward.1
= control target key start
LH: loop header
LB: loop body
LE: loop exit
PB: predicated region body
PF: predicated region fallthrough
CT: control target
= control target key end

     0   :  { %10 = vsyncpa [#allocation3], 0  ;;  %s998_s0 = inlined_call_operand.vmem [shape: f32[8,12], index: 0, kind: input, shape index: {}]   ;;  %s999_s1 = inlined_call_operand.hbm [shape: bf16[12,256], index: 1, kind: input, shape index: {}]   ;;  %s1000_s2 = inlined_call_operand.hbm [shape: bf16[2,128,128], index: 2, kind: input, shape index: {}]   ;;  %s1001_s3 = inlined_call_operand.hbm [shape: bf16[2,128,128], index: 3, kind: input, shape index: {}]   ;;  %s1002_s4 = inlined_call_operand.vmem [shape: f32[4,256], index: 4, kind: input, shape index: {}]   ;;  %s1003_s5 = inlined_call_operand.vmem [shape: bf16[8,128], index: 5, kind: output, shape index: {}]  }
   0x1   :  { %11 = vsyncpa [#allocation5], 0  ;;  %s858_s18 = smov [#allocation4]   ;;  %s788_s22 = scalar_lea.hbm %s1000_s2, 2048 }
   0x2   :  { %s31_s19 = sshll.u32 %s858_s18, 4  ;;  %p789_p0 = scmp.ne.s32.totalorder %s1000_s2, %s788_s22  ;;  %s32_s19 = int_to_ptr.vmem [resolvable:$true] %s31_s19 }
   0x3   :  { %p792_p1 = scmp.lt.u32.totalorder %s788_s22, %s1000_s2 }
   0x5   :  { %p794_p2 = pnand %p792_p1, %p789_p0 }
   0x7   :  { %797 = shalt.err (!%p794_p2)
}
   0x8   :  { %s798_s27 = scalar_lea.vmem %s32_s19, 2048  ;;  %p803_p4 = scmp.lt.s32.totalorder %s32_s19, %s32_s19 }
   0x9   :  { %p799_p3 = scmp.ne.s32.totalorder %s32_s19, %s798_s27  ;;  %p804_p5 = scmp.lt.s32.totalorder %s798_s27, %s798_s27 }
   0xb   :  { %p805_p6 = por %p804_p5, %p803_p4 }
   0xd   :  { %p806_p7 = pnand %p805_p6, %p799_p3 }
   0xf   :  { %809 = shalt.err (!%p806_p7)
}
  0x10   :  { %s859_s28 = smov 64   ;;  %s860_s29 = smov 4  }
  0x11   :  { %37 = dma.hbm_to_vmem [thread:$0]  %s1000_s2, 2048, %s32_s19, [#allocation5], %s859_s28, %s859_s28, %s860_s29  }
  0x12   :  { %s861_s7 = smov [#allocation2]   ;;  %s810_s11 = scalar_lea.hbm %s999_s1, 256 }
  0x13   :  { %s19_s8 = sshll.u32 %s861_s7, 4  ;;  %p811_p8 = scmp.ne.s32.totalorder %s999_s1, %s810_s11  ;;  %s20_s8 = int_to_ptr.vmem [resolvable:$true] %s19_s8 }
  0x14   :  { %p814_p9 = scmp.lt.u32.totalorder %s810_s11, %s999_s1 }
  0x16   :  { %p816_p10 = pnand %p814_p9, %p811_p8 }
  0x18   :  { %819 = shalt.err (!%p816_p10)
}
  0x19   :  { %s820_s16 = scalar_lea.vmem %s20_s8, 256  ;;  %p825_p12 = scmp.lt.s32.totalorder %s20_s8, %s20_s8 }
  0x1a   :  { %p821_p11 = scmp.ne.s32.totalorder %s20_s8, %s820_s16  ;;  %p826_p13 = scmp.lt.s32.totalorder %s820_s16, %s820_s16 }
  0x1c   :  { %p827_p0 = por %p826_p13, %p825_p12 }
  0x1e   :  { %p828_p1 = pnand %p827_p0, %p821_p11 }
  0x20   :  { %831 = shalt.err (!%p828_p1)
}
  0x21   :  { %s862_s2 = smov 128   ;;  %s863_s17 = smov 8  }
  0x22   :  { %25 = dma.hbm_to_vmem [thread:$0]  %s999_s1, 256, %s20_s8, [#allocation3], %s862_s2, %s862_s2, %s863_s17  }
  0x23   :  { %s864_s20 = smov [#allocation6]   ;;  %s832_s24 = scalar_lea.hbm %s1001_s3, 2048 }
  0x24   :  { %s43_s21 = sshll.u32 %s864_s20, 4  ;;  %p833_p2 = scmp.ne.s32.totalorder %s1001_s3, %s832_s24  ;;  %s44_s21 = int_to_ptr.vmem [resolvable:$true] %s43_s21 }
  0x25   :  { %p836_p3 = scmp.lt.u32.totalorder %s832_s24, %s1001_s3 }
  0x27   :  { %p838_p4 = pnand %p836_p3, %p833_p2 }
  0x29   :  { %841 = shalt.err (!%p838_p4)
}
  0x2a   :  { %s842_s6 = scalar_lea.vmem %s44_s21, 2048  ;;  %p847_p6 = scmp.lt.s32.totalorder %s44_s21, %s44_s21 }
  0x2b   :  { %p843_p5 = scmp.ne.s32.totalorder %s44_s21, %s842_s6  ;;  %p848_p7 = scmp.lt.s32.totalorder %s842_s6, %s842_s6 }
  0x2d   :  { %p849_p8 = por %p848_p7, %p847_p6 }
  0x2f   :  { %p850_p9 = pnand %p849_p8, %p843_p5 }
  0x31   :  { %853 = shalt.err (!%p850_p9)
}
  0x32   :  { %49 = dma.hbm_to_vmem [thread:$0]  %s1001_s3, 2048, %s44_s21, [#allocation5], %s859_s28, %s859_s28, %s860_s29  }
  0x33   :  { %854 = dma.done.wait [#allocation3], 256  }
  0x34   :  { %855 = vsyncadd [#allocation3], 4294967040 }
  0x35   :  { %856 = dma.done.wait [#allocation5], 4096  }
  0x36   :  { %857 = vsyncadd [#allocation5], 4294963200  ;;  %v865_v0 = vmov 0   ;;  %v866_v1 = vmov 0.0   ;;  %vm90_vm0 = vcmask 1045504   ;;  %v62_v4 = vld [vmem:[%s998_s0] sm:$0xff]  ;;  %v68_v23 = vlaneseq }
  0x37   :  { %129 = vmatprep.mubr.bf16.mxu0 %v865_v0  ;;  %663 = vmatprep.subr.bf16.mxu1 %v866_v1  ;;  %v753_v2 = vld [vmem:[#allocation2 + $0x4] ss:$8 sps:$4 sm:$0x3f]   ;;  %v755_v3 = vld [vmem:[#allocation2] ss:$8 sps:$4 sm:$0x3f]   ;;  %v63_v7 = vpack.c.bf16 %v62_v4, %v62_v4 }
  0x38   :  { %590 = vmatprep.subr.msk.bf16.mxu0 %vm90_vm0, %v753_v2  ;;  %v756_v5 = vld [vmem:[#allocation4] sm:$0xff]   ;;  %v92_v6 = vsel %vm90_vm0, %v755_v3, 0  ;;  %vm86_vm1 = vcmask 97280   ;;  %v758_v9 = vld [vmem:[#allocation4 + $0x8] sm:$0xff]   ;;  %v760_v11 = vld [vmem:[#allocation4 + $0x10] sm:$0xff]   ;;  %vm867_vm2 = vmmov 0  }
  0x39   :  { %v757_v8 = vld [vmem:[#allocation4 + $0x40] sm:$0xff]   ;;  %98 = vmatpush1.bf16.msra.mxu0 %v92_v6  ;;  %664 = vmatpush3.bf16.msra.mxu1 %v756_v5  ;;  %v759_v10 = vld [vmem:[#allocation4 + $0x48] sm:$0xff]   ;;  %v761_v12 = vld [vmem:[#allocation4 + $0x50] sm:$0xff]   ;;  %v69_v24 = vshrl.u32 %v68_v23, 7 }
  0x3a   :  { %683 = vmatprep.subr.bf16.mxu0 %v866_v1  ;;  %665 = vmatprep.subr.bf16.mxu1 %v866_v1  ;;  %v762_v13 = vld [vmem:[#allocation4 + $0x18] sm:$0xff]   ;;  %v764_v15 = vld [vmem:[#allocation4 + $0x20] sm:$0xff]   ;;  %v766_v17 = vld [vmem:[#allocation4 + $0x28] sm:$0xff]  }
  0x3b   :  { %v763_v14 = vld [vmem:[#allocation4 + $0x58] sm:$0xff]   ;;  %v765_v16 = vld [vmem:[#allocation4 + $0x60] sm:$0xff]   ;;  %v767_v18 = vld [vmem:[#allocation4 + $0x68] sm:$0xff]   ;;  %679 = vmatprep.mubr.msk.bf16.mxu1 %vm867_vm2, %v866_v1  ;;  %v70_v25 = vsub.s32 0, %v69_v24  ;;  %v74_v27 = vsub.s32 1, %v69_v24 }
  0x3c   :  { %591 = vmatmul.mubr.msk.bf16.vlgmr.msra.gmra.mrb[0].mxu0 %vm86_vm1, %v63_v7  ;;  %v768_v19 = vld [vmem:[#allocation4 + $0x30] sm:$0xff]   ;;  %v770_v21 = vld [vmem:[#allocation4 + $0x38] sm:$0xff]   ;;  %v773_v38 = vld [vmem:[#allocation6 + $0x40] sm:$0xff]  }
  0x3d   :  { %684 = vmatpush3.bf16.msra.mxu0 %v757_v8  ;;  %666 = vmatpush3.bf16.msra.mxu1 %v758_v9  ;;  %v769_v20 = vld [vmem:[#allocation4 + $0x70] sm:$0xff]   ;;  %v771_v22 = vld [vmem:[#allocation4 + $0x78] sm:$0xff]   ;;  %v772_v40 = vld [vmem:[#allocation6] sm:$0xff]  }
  0x3e   :  { %685 = vmatprep.subr.bf16.mxu0 %v866_v1  ;;  %667 = vmatprep.subr.bf16.mxu1 %v866_v1  ;;  %v66_v26 = vld [vmem:[%s1002_s4] ss:$4 sm:$0x3]  ;;  %v775_v42 = vld [vmem:[#allocation6 + $0x48] sm:$0xff]   ;;  %v779_v46 = vld [vmem:[#allocation6 + $0x58] sm:$0xff]  }
  0x3f   :  { %699 = vmatprep.mubr.msk.bf16.mxu0 %vm867_vm2, %v866_v1  ;;  %v71_v28 = vrot.slane %v66_v26, %v70_v25  ;;  %v75_v29 = vrot.slane %v66_v26, %v74_v27  ;;  %v774_v43 = vld [vmem:[#allocation6 + $0x8] sm:$0xff]   ;;  %v777_v44 = vld [vmem:[#allocation6 + $0x50] sm:$0xff]   ;;  %v778_v47 = vld [vmem:[#allocation6 + $0x18] sm:$0xff]  }
  0x40   :  { %v776_v45 = vld [vmem:[#allocation6 + $0x10] sm:$0xff]   ;;  %v781_v48 = vld [vmem:[#allocation6 + $0x60] sm:$0xff]   ;;  %v783_v50 = vld [vmem:[#allocation6 + $0x68] sm:$0xff]  }
  0x41   :  { %686 = vmatpush3.bf16.msra.mxu0 %v759_v10  ;;  %668 = vmatpush3.bf16.msra.mxu1 %v760_v11  ;;  %v780_v49 = vld [vmem:[#allocation6 + $0x20] sm:$0xff]   ;;  %v782_v51 = vld [vmem:[#allocation6 + $0x28] sm:$0xff]   ;;  %v784_v52 = vld [vmem:[#allocation6 + $0x30] sm:$0xff]  }
  0x42   :  { %687 = vmatprep.subr.bf16.mxu0 %v866_v1  ;;  %669 = vmatprep.subr.bf16.mxu1 %v866_v1  ;;  %v785_v53 = vld [vmem:[#allocation6 + $0x70] sm:$0xff]   ;;  %v786_v54 = vld [vmem:[#allocation6 + $0x38] sm:$0xff]  }
  0x43   :  { %v787_v55 = vld [vmem:[#allocation6 + $0x78] sm:$0xff]   ;;  %v592_v56 = vld [vmem:[%s1002_s4 + $0x1] ss:$0 sm:$0xff]  ;;  %v601_v57 = vld [vmem:[%s1002_s4 + $0x2] ss:$0 sm:$0xff] }
  0x44   :  { %v626_v10 = vld [vmem:[%s1002_s4 + $0x3] ss:$0 sm:$0xff] }
  0x45   :  { %688 = vmatpush3.bf16.msra.mxu0 %v761_v12  ;;  %670 = vmatpush3.bf16.msra.mxu1 %v762_v13 }
  0x46   :  { %689 = vmatprep.subr.bf16.mxu0 %v866_v1  ;;  %671 = vmatprep.subr.bf16.mxu1 %v866_v1 }
  0x49   :  { %690 = vmatpush3.bf16.msra.mxu0 %v763_v14  ;;  %672 = vmatpush3.bf16.msra.mxu1 %v764_v15 }
  0x4a   :  { %691 = vmatprep.subr.bf16.mxu0 %v866_v1  ;;  %673 = vmatprep.subr.bf16.mxu1 %v866_v1 }
  0x4d   :  { %692 = vmatpush3.bf16.msra.mxu0 %v765_v16  ;;  %674 = vmatpush3.bf16.msra.mxu1 %v766_v17 }
  0x4e   :  { %693 = vmatprep.subr.bf16.mxu0 %v866_v1  ;;  %675 = vmatprep.subr.bf16.mxu1 %v866_v1 }
  0x51   :  { %694 = vmatpush3.bf16.msra.mxu0 %v767_v18  ;;  %676 = vmatpush3.bf16.msra.mxu1 %v768_v19 }
  0x52   :  { %695 = vmatprep.subr.bf16.mxu0 %v866_v1  ;;  %677 = vmatprep.subr.bf16.mxu1 %v866_v1 }
  0x55   :  { %696 = vmatpush3.bf16.msra.mxu0 %v769_v20  ;;  %678 = vmatpush3.bf16.msra.mxu1 %v770_v21 }
  0x56   :  { %697 = vmatprep.subr.bf16.mxu0 %v866_v1  ;;  %703 = vmatprep.subr.bf16.mxu1 %v866_v1 }
  0x59   :  { %698 = vmatpush3.bf16.msra.mxu0 %v771_v22 }
  0x5a   :  { %723 = vmatprep.subr.bf16.mxu0 %v866_v1 }
 0x10f   :  { %v131_v30 = vpop.f32.mrb[0].mxu0 }
 0x110   :  { %v132_v31 = vadd.f32 %v131_v30, %v71_v28  ;;  %v133_v32 = vpop.f32.mrb[1].mxu0 }
 0x111   :  { %v134_v33 = vadd.f32 %v133_v32, %v75_v29  ;;  %v135_v34 = vpop.f32.mrb[2].mxu0 }
 0x112   :  { %v138_v35 = vmax.f32 %v132_v31, 0.0  ;;  %v136_v36 = vpop.f32.mrb[3].mxu0 }
 0x113   :  { %v139_v37 = vmax.f32 %v134_v33, 0.0 }
 0x114   :  { %v140_v39 = vpack.c.bf16 %v138_v35, %v138_v35 }
 0x115   :  { %v141_v41 = vpack.c.bf16 %v139_v37, %v139_v37 }
 0x116   :  { %680 = vmatmul.mubr.bf16.vlgmr.msra.gmra.mrb[0].mxu1 %v140_v39 }
 0x117   :  { %700 = vmatmul.mubr.bf16.vlgmr.msra.gmra.mrb[4].mxu0 %v141_v41  ;;  %704 = vmatpush3.bf16.msra.mxu1 %v773_v38 }
 0x118   :  { %724 = vmatpush3.bf16.msra.mxu0 %v772_v40  ;;  %705 = vmatprep.subr.bf16.mxu1 %v866_v1 }
 0x119   :  { %725 = vmatprep.subr.bf16.mxu0 %v866_v1  ;;  %739 = vmatprep.mubr.msk.bf16.mxu0 %vm867_vm2, %v866_v1 }
 0x11a   :  { %719 = vmatprep.mubr.msk.bf16.mxu1 %vm867_vm2, %v866_v1 }
 0x11b   :  { %706 = vmatpush3.bf16.msra.mxu1 %v775_v42 }
 0x11c   :  { %726 = vmatpush3.bf16.msra.mxu0 %v774_v43  ;;  %707 = vmatprep.subr.bf16.mxu1 %v866_v1 }
 0x11d   :  { %727 = vmatprep.subr.bf16.mxu0 %v866_v1 }
 0x11f   :  { %708 = vmatpush3.bf16.msra.mxu1 %v777_v44 }
 0x120   :  { %728 = vmatpush3.bf16.msra.mxu0 %v776_v45  ;;  %709 = vmatprep.subr.bf16.mxu1 %v866_v1 }
 0x121   :  { %729 = vmatprep.subr.bf16.mxu0 %v866_v1 }
 0x123   :  { %710 = vmatpush3.bf16.msra.mxu1 %v779_v46 }
 0x124   :  { %730 = vmatpush3.bf16.msra.mxu0 %v778_v47  ;;  %711 = vmatprep.subr.bf16.mxu1 %v866_v1 }
 0x125   :  { %731 = vmatprep.subr.bf16.mxu0 %v866_v1 }
 0x127   :  { %712 = vmatpush3.bf16.msra.mxu1 %v781_v48 }
 0x128   :  { %732 = vmatpush3.bf16.msra.mxu0 %v780_v49  ;;  %713 = vmatprep.subr.bf16.mxu1 %v866_v1 }
 0x129   :  { %733 = vmatprep.subr.bf16.mxu0 %v866_v1 }
 0x12b   :  { %714 = vmatpush3.bf16.msra.mxu1 %v783_v50 }
 0x12c   :  { %734 = vmatpush3.bf16.msra.mxu0 %v782_v51  ;;  %715 = vmatprep.subr.bf16.mxu1 %v866_v1 }
 0x12d   :  { %735 = vmatprep.subr.bf16.mxu0 %v866_v1 }
 0x12f   :  { %716 = vmatpush3.bf16.msra.mxu1 %v785_v53 }
 0x130   :  { %736 = vmatpush3.bf16.msra.mxu0 %v784_v52  ;;  %717 = vmatprep.subr.bf16.mxu1 %v866_v1 }
 0x131   :  { %737 = vmatprep.subr.bf16.mxu0 %v866_v1 }
 0x133   :  { %718 = vmatpush3.bf16.msra.mxu1 %v787_v55 }
 0x134   :  { %738 = vmatpush3.bf16.msra.mxu0 %v786_v54 }
 0x1e9   :  { %v245_v58 = vpop.f32.mrb[0].mxu1 }
 0x1ea   :  { %v246_v59 = vadd.f32 %v592_v56, %v245_v58  ;;  %v681_v60 = vpop.f32.mrb[1].mxu1  ;;  %v357_v61 = vpop.f32.mrb[4].mxu0 }
 0x1eb   :  { %v358_v62 = vadd.f32 %v601_v57, %v357_v61  ;;  %v248_v63 = vpop.f32.mrb[2].mxu1  ;;  %v701_v0 = vpop.f32.mrb[5].mxu0 }
 0x1ec   :  { %v251_v1 = vmax.f32 %v246_v59, 0.0  ;;  %v682_v2 = vpop.f32.mrb[3].mxu1  ;;  %v360_v3 = vpop.f32.mrb[6].mxu0 }
 0x1ed   :  { %v363_v4 = vmax.f32 %v358_v62, 0.0  ;;  %v702_v5 = vpop.f32.mrb[7].mxu0 }
 0x1ee   :  { %v252_v6 = vpack.c.bf16 %v251_v1, %v251_v1 }
 0x1ef   :  { %v364_v7 = vpack.c.bf16 %v363_v4, %v363_v4 }
 0x1f0   :  { %740 = vmatmul.mubr.bf16.vlgmr.msra.gmra.mrb[8].mxu0 %v252_v6 }
 0x1f1   :  { %720 = vmatmul.mubr.bf16.vlgmr.msra.gmra.mrb[4].mxu1 %v364_v7 }
 0x2c3   :  { %v568_v8 = vpop.f32.mrb[8].mxu0 }
 0x2c4   :  { %v480_v9 = vpop.f32.mrb[4].mxu1  ;;  %v741_v11 = vpop.f32.mrb[9].mxu0 }
 0x2c5   :  { %v569_v12 = vadd.f32 %v568_v8, %v480_v9  ;;  %v721_v13 = vpop.f32.mrb[5].mxu1  ;;  %v571_v14 = vpop.f32.mrb[10].mxu0 }
 0x2c6   :  { %v483_v15 = vpop.f32.mrb[6].mxu1  ;;  %v742_v16 = vpop.f32.mrb[11].mxu0 }
 0x2c7   :  { %v579_v17 = vadd.f32 %v626_v10, %v569_v12  ;;  %v722_v18 = vpop.f32.mrb[7].mxu1 }
 0x2c9   :  { %v580_v19 = vpack.c.bf16 %v579_v17, %v579_v17 }
 0x2cb   :  { %581 = vst [vmem:[%s1003_s5] sm:$0xf] %v580_v19 }
 0x2cc   :  { %586 = vsyncpa [#allocation3], 1 }
 0x2cd   :  { %587 = vsyncpa [#allocation5], 1 }

</bundles_post_ra>
